<compile_context>
chip_gen: v7x
topology: tpu7x:2x2x1
jax: 0.10.0
libtpu: 0.0.40
codegen_flags: <defaults>
</compile_context>

<pallas_src>
import jax
import jax.numpy as jnp
from jax.experimental import pallas as pl
from jax.experimental.pallas import tpu as pltpu


_LANES = 128
_ROW_ALIGN = 32                    # row alignment (covers f32/bf16/int8 tiling)
_S_ALIGN = _LANES * _ROW_ALIGN     # 4096 lanes
_MAX_ROW_TILE = 1024               # cap a single step at 128K lanes


def _vmem_capacity_bytes():
    """Per-core VMEM capacity; conservative 64 MiB (v7x) fallback."""
    try:
        info = pltpu.get_tpu_info()
        cap = getattr(info, "vmem_capacity_bytes", None)
        if cap:
            return int(cap)
    except Exception:
        pass
    return 64 * 1024 * 1024


def _pick_row_tile(R, C, x_itemsize, y_itemsize, vmem_budget):
    """Largest multiple-of-32 divisor of R whose working set fits the budget."""
    # Bytes per 128-lane row resident during a step: double-buffered x and y
    # tiles plus the f32 in-kernel temporaries (cast copy, exp array, ~10
    # (RT, 128) intermediates).  Deliberately conservative.
    per_row = (2 * C * _LANES * x_itemsize
               + 2 * _LANES * y_itemsize
               + (2 * C + 10) * _LANES * 4)
    rt_cap = max(_ROW_ALIGN, (vmem_budget // per_row) // _ROW_ALIGN * _ROW_ALIGN)
    rt_cap = min(rt_cap, _MAX_ROW_TILE, R)
    best = _ROW_ALIGN
    t = _ROW_ALIGN
    while t <= rt_cap:
        if R % t == 0:
            best = t
        t += _ROW_ALIGN
    return best


def _soft_dice_kernel(x_ref, y_ref, acc_ref):
    # x_ref:   (C, RT, 128) logits tile (native dtype; math in f32)
    # y_ref:   (RT, 128) integer label tile (int8 or int32)
    # acc_ref: (6, 8, 128) f32 output block, resident across the spatial axis.
    #          Rows: tp0, tp1, sum(sm0), sum(sm1), cnt0, cnt1 partial sums.
    k = pl.program_id(2)

    @pl.when(k == 0)
    def _init():
        acc_ref[...] = jnp.zeros_like(acc_ref)

    x = x_ref[...].astype(jnp.float32)            # (C, RT, 128)
    rt = x.shape[1]

    # Numerically stable softmax over the leading channel axis: channel
    # reductions are plain leading-axis VPU max/add on dense (RT, 128) tiles.
    xm = jnp.max(x, axis=0)                       # (RT, 128)
    e = jnp.exp(x - xm[None, :, :])               # (C, RT, 128)
    inv = 1.0 / jnp.sum(e, axis=0)                # one exact divide per pixel
    sm0 = e[0] * inv                              # (RT, 128)
    sm1 = e[1] * inv

    # Only classes 0 and 1 feed the loss (dc[:, :2]): two scalar compares,
    # no broadcasted_iota regenerated every step.
    yi = y_ref[...].astype(jnp.int32)
    m0 = (yi == 0).astype(jnp.float32)
    m1 = (yi == 1).astype(jnp.float32)

    # Per-step in-tile reduction: (RT, 128) -> (8, 128) via leading-axis VPU
    # adds (pure leading-dim split reshape, no relayout).  Cross-lane work is
    # deferred entirely to the tiny JAX glue after the kernel.
    def rsum(v):
        return jnp.sum(v.reshape(rt // 8, 8, _LANES), axis=0)

    acc_ref[0] += rsum(sm0 * m0)
    acc_ref[1] += rsum(sm1 * m1)
    acc_ref[2] += rsum(sm0)
    acc_ref[3] += rsum(sm1)
    acc_ref[4] += rsum(m0)
    acc_ref[5] += rsum(m1)


def soft_dice_loss(x, y, smooth=1.0):
    """SoftDiceLoss forward (softmax nonlin, batch_dice=False, square=False).

    x: (B, C, H, W) logits (float32 or bfloat16).
    y: (B, H, W) or (B, 1, H, W) integer label map.
    """
    # TODO(synk): non-default paths (loss_mask, batch_dice=True, square=True) not implemented.
    B, C, H, W = x.shape
    if C < 2:
        raise ValueError("SoftDiceLoss kernel needs C >= 2 (loss uses dc[:, :2]).")
    S = H * W
    S_pad = -(-S // _S_ALIGN) * _S_ALIGN
    n_pad = S_pad - S
    R = S_pad // _LANES

    x_flat = x.reshape(B, C, S)
    # int8 labels cut the label stream ~4x on bandwidth-bound v5e/v6e.
    label_dtype = jnp.int8 if C <= 127 else jnp.int32
    y_flat = y.reshape(B, S).astype(label_dtype)

    if n_pad:
        # Padded labels are class 2 (never 0/1) -> tp/cnt untouched.  For
        # C >= 3 the padded logits give classes 0/1 exactly zero softmax mass
        # (exp underflows to 0); for C == 2 the uniform-logit mass (0.5/class)
        # is subtracted exactly in the glue below.
        pad_x = jnp.zeros((B, C, n_pad), dtype=x.dtype)
        if C >= 3:
            pad_x = pad_x.at[:, :2, :].set(jnp.asarray(-1e9, dtype=x.dtype))
        x_flat = jnp.concatenate([x_flat, pad_x], axis=-1)
        y_flat = jnp.concatenate(
            [y_flat, jnp.full((B, n_pad), 2, dtype=label_dtype)], axis=-1)

    x4 = x_flat.reshape(B, C, R, _LANES)
    y3 = y_flat.reshape(B, R, _LANES)

    # Generation-aware tile sizing + explicit scoped-VMEM limit.
    cap = _vmem_capacity_bytes()
    tile_budget = min(int(cap * 0.375), 40 * 2**20)     # ~24 MiB on v7x, 40 MiB on v5e/v6e
    vmem_limit = int(min(cap * 3 // 4, 56 * 2**20))
    RT = _pick_row_tile(R, C, x.dtype.itemsize, y3.dtype.itemsize, tile_budget)

    kt = R // RT                                  # spatial steps per batch item
    # Single-TC chips (v5e/v6e): no split.  Keep B*n_split even for v7x's 2 TCs.
    n_split = 2 if (B % 2 == 1 and kt >= 2 and kt % 2 == 0) else 1
    kps = kt // n_split

    out = pl.pallas_call(
        _soft_dice_kernel,
        out_shape=jax.ShapeDtypeStruct((B, n_split, 6, 8, _LANES), jnp.float32),
        grid_spec=pltpu.PrefetchScalarGridSpec(
            num_scalar_prefetch=0,
            grid=(B, n_split, kps),
            in_specs=[
                pl.BlockSpec((None, C, RT, _LANES),
                             lambda b, s, k: (b, 0, s * kps + k, 0)),
                pl.BlockSpec((None, RT, _LANES),
                             lambda b, s, k: (b, s * kps + k, 0)),
            ],
            out_specs=pl.BlockSpec((None, None, 6, 8, _LANES),
                                   lambda b, s, k: (b, s, 0, 0, 0)),
        ),
        compiler_params=pltpu.CompilerParams(
            dimension_semantics=("parallel", "parallel", "arbitrary"),
            vmem_limit_bytes=vmem_limit),
    )(x4, y3)

    # Tiny glue: sum the packed partials over splits / sublanes / lanes.
    res = jnp.sum(out, axis=(1, 3, 4))            # (B, 6)
    tp = res[:, 0:2]                              # sum_S(sm_c * [y == c])
    sm = res[:, 2:4]                              # sum_S(sm_c)
    cnt = res[:, 4:6]                             # count(y == c)
    if n_pad and C == 2:
        sm = sm - (n_pad * 0.5)                   # remove padded uniform-softmax mass
    fp = sm - tp
    fn = cnt - tp
    dc = (2.0 * tp + smooth) / (2.0 * tp + fp + fn + smooth)
    return 1.0 - jnp.mean(dc)                     # == 1 - dc[:, :2].mean()


def _reference_loss(x, y, smooth=1.0):
    # Pure-JAX reference mirroring the torch code, for a sanity check.
    xs = jax.nn.softmax(x.astype(jnp.float32), axis=1)
    C = x.shape[1]
    y1h = jax.nn.one_hot(y, C, dtype=jnp.float32).transpose(0, 3, 1, 2)
    tp = jnp.sum(xs * y1h, axis=(2, 3))
    fp = jnp.sum(xs * (1.0 - y1h), axis=(2, 3))
    fn = jnp.sum((1.0 - xs) * y1h, axis=(2, 3))
    dc = (2.0 * tp + smooth) / (2.0 * tp + fp + fn + smooth)
    return 1.0 - jnp.mean(dc[:, :2])


if __name__ == "__main__":
    key = jax.random.PRNGKey(0)
    kx, ky = jax.random.split(key)

    # Main test: small shape consistent with the module.
    B, C, H, W = 2, 4, 16, 16
    x = jax.random.normal(kx, (B, C, H, W), dtype=jnp.float32)
    y = jax.random.randint(ky, (B, H, W), 0, C, dtype=jnp.int32)
    loss = jax.block_until_ready(soft_dice_loss(x, y))
    ref = jax.block_until_ready(_reference_loss(x, y))
    assert jnp.allclose(loss, ref, atol=1e-5, rtol=1e-5), (loss, ref)

    # Secondary test: odd batch, C=3, spatial size not a multiple of 128
    # (exercises the padding path exactly).
    k2x, k2y = jax.random.split(jax.random.PRNGKey(1))
    x2 = jax.random.normal(k2x, (1, 3, 9, 9), dtype=jnp.float32)
    y2 = jax.random.randint(k2y, (1, 9, 9), 0, 3, dtype=jnp.int32)
    loss2 = jax.block_until_ready(soft_dice_loss(x2, y2))
    ref2 = jax.block_until_ready(_reference_loss(x2, y2))
    assert jnp.allclose(loss2, ref2, atol=1e-5, rtol=1e-5), (loss2, ref2)

    print("KERNEL_OK")
</pallas_src>

<mosaic_0001>
module attributes {stable_mosaic.version = 11 : i64} {
  func.func @_soft_dice_kernel(%arg0: i32, %arg1: i32, %arg2: i32, %arg3: memref<1x4x32x128xf32, #tpu.memory_space<vmem>>, %arg4: memref<1x32x128xi8, #tpu.memory_space<vmem>>, %arg5: memref<1x1x6x8x128xf32, #tpu.memory_space<vmem>>) attributes {dimension_semantics = [#tpu.dimension_semantics<parallel>, #tpu.dimension_semantics<parallel>, #tpu.dimension_semantics<arbitrary>], iteration_bounds = array<i64: 2, 1, 1>, scalar_prefetch = 0 : i64, scratch_operands = 0 : i64, tpu.core_type = #tpu.core_type<tc>, window_params = [{transform_indices = @transform_0, window_bounds = array<i64: 1, 4, 32, 128>}, {transform_indices = @transform_1, window_bounds = array<i64: 1, 32, 128>}, {transform_indices = @transform_2, window_bounds = array<i64: 1, 1, 6, 8, 128>}]} {
    %c0_i32 = arith.constant 0 : i32
    %0 = arith.cmpi eq, %arg2, %c0_i32 : i32
    %1 = arith.extui %0 : i1 to i32
    %c0_i32_0 = arith.constant 0 : i32
    %2 = arith.cmpi ne, %1, %c0_i32_0 : i32
    scf.if %2 {
      %cst_71 = arith.constant 0.000000e+00 : f32
      %80 = vector.broadcast %cst_71 : f32 to vector<6x8x128xf32>
      %c0_72 = arith.constant 0 : index
      %c0_73 = arith.constant 0 : index
      %c0_74 = arith.constant 0 : index
      %c0_75 = arith.constant 0 : index
      %c0_76 = arith.constant 0 : index
      %81 = vector.load %arg5[%c0_72, %c0_73, %c0_74, %c0_75, %c0_76] : memref<1x1x6x8x128xf32, #tpu.memory_space<vmem>>, vector<1x1x6x8x128xf32>
      %82 = vector.shape_cast %81 : vector<1x1x6x8x128xf32> to vector<6x8x128xf32>
      %83 = vector.shape_cast %80 : vector<6x8x128xf32> to vector<1x1x6x8x128xf32>
      tpu.vector_store %arg5[%c0_72, %c0_73, %c0_74, %c0_75, %c0_76], %83 {strides = array<i32>} : memref<1x1x6x8x128xf32, #tpu.memory_space<vmem>>, vector<1x1x6x8x128xf32>,
    } else {
    }
    %c0 = arith.constant 0 : index
    %c0_1 = arith.constant 0 : index
    %c0_2 = arith.constant 0 : index
    %c0_3 = arith.constant 0 : index
    %3 = vector.load %arg3[%c0, %c0_1, %c0_2, %c0_3] : memref<1x4x32x128xf32, #tpu.memory_space<vmem>>, vector<1x4x32x128xf32>
    %4 = vector.shape_cast %3 : vector<1x4x32x128xf32> to vector<4x32x128xf32>
    %cst = arith.constant dense<0xFF800000> : vector<32x128xf32>
    %5 = vector.multi_reduction <maximumf>, %4, %cst [0] : vector<4x32x128xf32> to vector<32x128xf32>
    %6 = vector.shape_cast %5 : vector<32x128xf32> to vector<1x32x128xf32>
    %7 = vector.broadcast %6 : vector<1x32x128xf32> to vector<4x32x128xf32>
    %8 = arith.subf %4, %7 : vector<4x32x128xf32>
    %9 = math.exp %8 : vector<4x32x128xf32>
    %cst_4 = arith.constant dense<0.000000e+00> : vector<32x128xf32>
    %10 = vector.multi_reduction <add>, %9, %cst_4 [0] : vector<4x32x128xf32> to vector<32x128xf32>
    %cst_5 = arith.constant 1.000000e+00 : f32
    %11 = vector.broadcast %cst_5 : f32 to vector<32x128xf32>
    %12 = arith.divf %11, %10 : vector<32x128xf32>
    %13 = vector.extract_strided_slice %9 {offsets = [0, 0, 0], sizes = [1, 32, 128], strides = [1, 1, 1]} : vector<4x32x128xf32> to vector<1x32x128xf32>
    %14 = vector.shape_cast %13 : vector<1x32x128xf32> to vector<32x128xf32>
    %15 = arith.mulf %14, %12 : vector<32x128xf32>
    %16 = vector.extract_strided_slice %9 {offsets = [1, 0, 0], sizes = [1, 32, 128], strides = [1, 1, 1]} : vector<4x32x128xf32> to vector<1x32x128xf32>
    %17 = vector.shape_cast %16 : vector<1x32x128xf32> to vector<32x128xf32>
    %18 = arith.mulf %17, %12 : vector<32x128xf32>
    %c0_6 = arith.constant 0 : index
    %c0_7 = arith.constant 0 : index
    %c0_8 = arith.constant 0 : index
    %19 = vector.load %arg4[%c0_6, %c0_7, %c0_8] : memref<1x32x128xi8, #tpu.memory_space<vmem>>, vector<1x32x128xi8>
    %20 = vector.shape_cast %19 : vector<1x32x128xi8> to vector<32x128xi8>
    %21 = arith.extsi %20 : vector<32x128xi8> to vector<32x128xi32>
    %c0_i32_9 = arith.constant 0 : i32
    %22 = vector.broadcast %c0_i32_9 : i32 to vector<32x128xi32>
    %23 = arith.cmpi eq, %21, %22 : vector<32x128xi32>
    %24 = arith.extui %23 : vector<32x128xi1> to vector<32x128xi32>
    %25 = arith.sitofp %24 : vector<32x128xi32> to vector<32x128xf32>
    %c1_i32 = arith.constant 1 : i32
    %26 = vector.broadcast %c1_i32 : i32 to vector<32x128xi32>
    %27 = arith.cmpi eq, %21, %26 : vector<32x128xi32>
    %28 = arith.extui %27 : vector<32x128xi1> to vector<32x128xi32>
    %29 = arith.sitofp %28 : vector<32x128xi32> to vector<32x128xf32>
    %c0_10 = arith.constant 0 : index
    %c0_11 = arith.constant 0 : index
    %c0_12 = arith.constant 0 : index
    %c0_13 = arith.constant 0 : index
    %c0_14 = arith.constant 0 : index
    %30 = vector.load %arg5[%c0_10, %c0_11, %c0_12, %c0_13, %c0_14] : memref<1x1x6x8x128xf32, #tpu.memory_space<vmem>>, vector<1x1x1x8x128xf32>
    %31 = vector.shape_cast %30 : vector<1x1x1x8x128xf32> to vector<8x128xf32>
    %32 = arith.mulf %15, %25 : vector<32x128xf32>
    %33 = vector.shape_cast %32 : vector<32x128xf32> to vector<4x8x128xf32>
    %cst_15 = arith.constant dense<0.000000e+00> : vector<8x128xf32>
    %34 = vector.multi_reduction <add>, %33, %cst_15 [0] : vector<4x8x128xf32> to vector<8x128xf32>
    %35 = arith.addf %31, %34 : vector<8x128xf32>
    %c0_16 = arith.constant 0 : index
    %c0_17 = arith.constant 0 : index
    %c0_18 = arith.constant 0 : index
    %c0_19 = arith.constant 0 : index
    %c0_20 = arith.constant 0 : index
    %36 = vector.load %arg5[%c0_16, %c0_17, %c0_18, %c0_19, %c0_20] : memref<1x1x6x8x128xf32, #tpu.memory_space<vmem>>, vector<1x1x1x8x128xf32>
    %37 = vector.shape_cast %36 : vector<1x1x1x8x128xf32> to vector<8x128xf32>
    %38 = vector.shape_cast %35 : vector<8x128xf32> to vector<1x1x1x8x128xf32>
    tpu.vector_store %arg5[%c0_16, %c0_17, %c0_18, %c0_19, %c0_20], %38 {strides = array<i32>} : memref<1x1x6x8x128xf32, #tpu.memory_space<vmem>>, vector<1x1x1x8x128xf32>,
    %c0_21 = arith.constant 0 : index
    %c0_22 = arith.constant 0 : index
    %c1 = arith.constant 1 : index
    %c0_23 = arith.constant 0 : index
    %c0_24 = arith.constant 0 : index
    %39 = vector.load %arg5[%c0_21, %c0_22, %c1, %c0_23, %c0_24] : memref<1x1x6x8x128xf32, #tpu.memory_space<vmem>>, vector<1x1x1x8x128xf32>
    %40 = vector.shape_cast %39 : vector<1x1x1x8x128xf32> to vector<8x128xf32>
    %41 = arith.mulf %18, %29 : vector<32x128xf32>
    %42 = vector.shape_cast %41 : vector<32x128xf32> to vector<4x8x128xf32>
    %cst_25 = arith.constant dense<0.000000e+00> : vector<8x128xf32>
    %43 = vector.multi_reduction <add>, %42, %cst_25 [0] : vector<4x8x128xf32> to vector<8x128xf32>
    %44 = arith.addf %40, %43 : vector<8x128xf32>
    %c0_26 = arith.constant 0 : index
    %c0_27 = arith.constant 0 : index
    %c1_28 = arith.constant 1 : index
    %c0_29 = arith.constant 0 : index
    %c0_30 = arith.constant 0 : index
    %45 = vector.load %arg5[%c0_26, %c0_27, %c1_28, %c0_29, %c0_30] : memref<1x1x6x8x128xf32, #tpu.memory_space<vmem>>, vector<1x1x1x8x128xf32>
    %46 = vector.shape_cast %45 : vector<1x1x1x8x128xf32> to vector<8x128xf32>
    %47 = vector.shape_cast %44 : vector<8x128xf32> to vector<1x1x1x8x128xf32>
    tpu.vector_store %arg5[%c0_26, %c0_27, %c1_28, %c0_29, %c0_30], %47 {strides = array<i32>} : memref<1x1x6x8x128xf32, #tpu.memory_space<vmem>>, vector<1x1x1x8x128xf32>,
    %c0_31 = arith.constant 0 : index
    %c0_32 = arith.constant 0 : index
    %c2 = arith.constant 2 : index
    %c0_33 = arith.constant 0 : index
    %c0_34 = arith.constant 0 : index
    %48 = vector.load %arg5[%c0_31, %c0_32, %c2, %c0_33, %c0_34] : memref<1x1x6x8x128xf32, #tpu.memory_space<vmem>>, vector<1x1x1x8x128xf32>
    %49 = vector.shape_cast %48 : vector<1x1x1x8x128xf32> to vector<8x128xf32>
    %50 = vector.shape_cast %15 : vector<32x128xf32> to vector<4x8x128xf32>
    %cst_35 = arith.constant dense<0.000000e+00> : vector<8x128xf32>
    %51 = vector.multi_reduction <add>, %50, %cst_35 [0] : vector<4x8x128xf32> to vector<8x128xf32>
    %52 = arith.addf %49, %51 : vector<8x128xf32>
    %c0_36 = arith.constant 0 : index
    %c0_37 = arith.constant 0 : index
    %c2_38 = arith.constant 2 : index
    %c0_39 = arith.constant 0 : index
    %c0_40 = arith.constant 0 : index
    %53 = vector.load %arg5[%c0_36, %c0_37, %c2_38, %c0_39, %c0_40] : memref<1x1x6x8x128xf32, #tpu.memory_space<vmem>>, vector<1x1x1x8x128xf32>
    %54 = vector.shape_cast %53 : vector<1x1x1x8x128xf32> to vector<8x128xf32>
    %55 = vector.shape_cast %52 : vector<8x128xf32> to vector<1x1x1x8x128xf32>
    tpu.vector_store %arg5[%c0_36, %c0_37, %c2_38, %c0_39, %c0_40], %55 {strides = array<i32>} : memref<1x1x6x8x128xf32, #tpu.memory_space<vmem>>, vector<1x1x1x8x128xf32>,
    %c0_41 = arith.constant 0 : index
    %c0_42 = arith.constant 0 : index
    %c3 = arith.constant 3 : index
    %c0_43 = arith.constant 0 : index
    %c0_44 = arith.constant 0 : index
    %56 = vector.load %arg5[%c0_41, %c0_42, %c3, %c0_43, %c0_44] : memref<1x1x6x8x128xf32, #tpu.memory_space<vmem>>, vector<1x1x1x8x128xf32>
    %57 = vector.shape_cast %56 : vector<1x1x1x8x128xf32> to vector<8x128xf32>
    %58 = vector.shape_cast %18 : vector<32x128xf32> to vector<4x8x128xf32>
    %cst_45 = arith.constant dense<0.000000e+00> : vector<8x128xf32>
    %59 = vector.multi_reduction <add>, %58, %cst_45 [0] : vector<4x8x128xf32> to vector<8x128xf32>
    %60 = arith.addf %57, %59 : vector<8x128xf32>
    %c0_46 = arith.constant 0 : index
    %c0_47 = arith.constant 0 : index
    %c3_48 = arith.constant 3 : index
    %c0_49 = arith.constant 0 : index
    %c0_50 = arith.constant 0 : index
    %61 = vector.load %arg5[%c0_46, %c0_47, %c3_48, %c0_49, %c0_50] : memref<1x1x6x8x128xf32, #tpu.memory_space<vmem>>, vector<1x1x1x8x128xf32>
    %62 = vector.shape_cast %61 : vector<1x1x1x8x128xf32> to vector<8x128xf32>
    %63 = vector.shape_cast %60 : vector<8x128xf32> to vector<1x1x1x8x128xf32>
    tpu.vector_store %arg5[%c0_46, %c0_47, %c3_48, %c0_49, %c0_50], %63 {strides = array<i32>} : memref<1x1x6x8x128xf32, #tpu.memory_space<vmem>>, vector<1x1x1x8x128xf32>,
    %c0_51 = arith.constant 0 : index
    %c0_52 = arith.constant 0 : index
    %c4 = arith.constant 4 : index
    %c0_53 = arith.constant 0 : index
    %c0_54 = arith.constant 0 : index
    %64 = vector.load %arg5[%c0_51, %c0_52, %c4, %c0_53, %c0_54] : memref<1x1x6x8x128xf32, #tpu.memory_space<vmem>>, vector<1x1x1x8x128xf32>
    %65 = vector.shape_cast %64 : vector<1x1x1x8x128xf32> to vector<8x128xf32>
    %66 = vector.shape_cast %25 : vector<32x128xf32> to vector<4x8x128xf32>
    %cst_55 = arith.constant dense<0.000000e+00> : vector<8x128xf32>
    %67 = vector.multi_reduction <add>, %66, %cst_55 [0] : vector<4x8x128xf32> to vector<8x128xf32>
    %68 = arith.addf %65, %67 : vector<8x128xf32>
    %c0_56 = arith.constant 0 : index
    %c0_57 = arith.constant 0 : index
    %c4_58 = arith.constant 4 : index
    %c0_59 = arith.constant 0 : index
    %c0_60 = arith.constant 0 : index
    %69 = vector.load %arg5[%c0_56, %c0_57, %c4_58, %c0_59, %c0_60] : memref<1x1x6x8x128xf32, #tpu.memory_space<vmem>>, vector<1x1x1x8x128xf32>
    %70 = vector.shape_cast %69 : vector<1x1x1x8x128xf32> to vector<8x128xf32>
    %71 = vector.shape_cast %68 : vector<8x128xf32> to vector<1x1x1x8x128xf32>
    tpu.vector_store %arg5[%c0_56, %c0_57, %c4_58, %c0_59, %c0_60], %71 {strides = array<i32>} : memref<1x1x6x8x128xf32, #tpu.memory_space<vmem>>, vector<1x1x1x8x128xf32>,
    %c0_61 = arith.constant 0 : index
    %c0_62 = arith.constant 0 : index
    %c5 = arith.constant 5 : index
    %c0_63 = arith.constant 0 : index
    %c0_64 = arith.constant 0 : index
    %72 = vector.load %arg5[%c0_61, %c0_62, %c5, %c0_63, %c0_64] : memref<1x1x6x8x128xf32, #tpu.memory_space<vmem>>, vector<1x1x1x8x128xf32>
    %73 = vector.shape_cast %72 : vector<1x1x1x8x128xf32> to vector<8x128xf32>
    %74 = vector.shape_cast %29 : vector<32x128xf32> to vector<4x8x128xf32>
    %cst_65 = arith.constant dense<0.000000e+00> : vector<8x128xf32>
    %75 = vector.multi_reduction <add>, %74, %cst_65 [0] : vector<4x8x128xf32> to vector<8x128xf32>
    %76 = arith.addf %73, %75 : vector<8x128xf32>
    %c0_66 = arith.constant 0 : index
    %c0_67 = arith.constant 0 : index
    %c5_68 = arith.constant 5 : index
    %c0_69 = arith.constant 0 : index
    %c0_70 = arith.constant 0 : index
    %77 = vector.load %arg5[%c0_66, %c0_67, %c5_68, %c0_69, %c0_70] : memref<1x1x6x8x128xf32, #tpu.memory_space<vmem>>, vector<1x1x1x8x128xf32>
    %78 = vector.shape_cast %77 : vector<1x1x1x8x128xf32> to vector<8x128xf32>
    %79 = vector.shape_cast %76 : vector<8x128xf32> to vector<1x1x1x8x128xf32>
    tpu.vector_store %arg5[%c0_66, %c0_67, %c5_68, %c0_69, %c0_70], %79 {strides = array<i32>} : memref<1x1x6x8x128xf32, #tpu.memory_space<vmem>>, vector<1x1x1x8x128xf32>,
    return
  }
  func.func @transform_0(%arg0: i32, %arg1: i32, %arg2: i32) -> (i32, i32, i32, i32) {
    %c1_i32 = arith.constant 1 : i32
    %0 = arith.muli %arg1, %c1_i32 : i32
    %1 = arith.addi %0, %arg2 : i32
    %c0_i32 = arith.constant 0 : i32
    %c0_i32_0 = arith.constant 0 : i32
    %c0_i32_1 = arith.constant 0 : i32
    return %arg0, %c0_i32, %1, %c0_i32_0 : i32, i32, i32, i32
  }
  func.func @transform_1(%arg0: i32, %arg1: i32, %arg2: i32) -> (i32, i32, i32) {
    %c1_i32 = arith.constant 1 : i32
    %0 = arith.muli %arg1, %c1_i32 : i32
    %1 = arith.addi %0, %arg2 : i32
    %c0_i32 = arith.constant 0 : i32
    %c0_i32_0 = arith.constant 0 : i32
    return %arg0, %1, %c0_i32 : i32, i32, i32
  }
  func.func @transform_2(%arg0: i32, %arg1: i32, %arg2: i32) -> (i32, i32, i32, i32, i32) {
    %c0_i32 = arith.constant 0 : i32
    %c0_i32_0 = arith.constant 0 : i32
    %c0_i32_1 = arith.constant 0 : i32
    %c0_i32_2 = arith.constant 0 : i32
    return %arg0, %arg1, %c0_i32, %c0_i32_0, %c0_i32_1 : i32, i32, i32, i32, i32
  }
}

</mosaic_0001>

<bundles_post_ra>
// kernel: tpu_custom_call.1
= control target key start
LH: loop header
LB: loop body
LE: loop exit
PB: predicated region body
PF: predicated region fallthrough
CT: control target
= control target key end

     0   :  { %7 = vsyncpa [#allocation3], 0  ;;  %s1165_s0 = inlined_call_operand.hbm [shape: f32[2,4,32,128], index: 0, kind: input, shape index: {}]   ;;  %s1166_s1 = inlined_call_operand.hbm [shape: s8[2,32,128], index: 1, kind: input, shape index: {}]   ;;  %s1167_s2 = inlined_call_operand.hbm [shape: f32[2,1,6,8,128], index: 2, kind: output, shape index: {}]  }
   0x1   :  { %9 = vsyncpa [#allocation3 + $0x1], 0 }
   0x2   :  { %10 = vsyncpa [#allocation6], 0 }
   0x3   :  { %12 = vsyncpa [#allocation6 + $0x1], 0 }
   0x4   :  { %13 = vsyncpa [#allocation4], 0 }
   0x5   :  { %15 = vsyncpa [#allocation4 + $0x1], 0  ;;  %s879_s9 = smov 0   ;;  %s881_s10 = smov 0  }
   0x6   :  { %s883_s11 = smov 0   ;;  %s885_s12 = smov 0  }
   0x7   :  { %s887_s13 = smov 0   ;;  %s889_s14 = smov 0  }
   0x8 LB: > { %s560_s15 = sadd.s32 4294967295, %s854_s14   ;;  %s561_s16 = sadd.s32 4294967294, %s854_s14   ;;  %s854_s14 = sphi %s889_s14, %s21_s14   ;;  %s850_s13 = sphi %s887_s13, %s1190_s13   ;;  %s846_s12 = sphi %s885_s12, %s1189_s12   ;;  %s842_s11 = sphi %s883_s11, %s1188_s11   ;;  %s838_s10 = sphi %s881_s10, %s1187_s10   ;;  %s834_s9 = sphi %s879_s9, %s1186_s9  }
   0x9   : > { %s40_s17 = sadd.s32 1, %s850_s13  ;;  %s51_s18 = sadd.s32 1, %s842_s11 }
   0xa   : > { %p42_p0 = scmp.ge.s32.totalorder %s40_s17, 2  ;;  %p58_p1 = scmp.ne.s32.totalorder %s842_s11, %s838_s10 }
   0xb   : > { %p59_p2 = scmp.eq.s32.totalorder %s854_s14, 0  ;;  %p64_p3 = scmp.ne.s32.totalorder %s838_s10, %s834_s9 }
   0xc   : > { %s1192_s17 = smov (%p42_p0, %s40_s17), 0  ;;  %p65_p5 = scmp.eq.s32.totalorder %s560_s15, 0 }
   0xd   : > { %p920_p4 = por %p59_p2, %p58_p1  ;;  %s46_s20 = ssub.s32 %s850_s13, %s1192_s17 }
   0xe   : > { %p120_p6 = scmp.eq.s32.totalorder %s560_s15, 1  ;;  %p49_p7 = scmp.eq.s32.totalorder %s46_s20, 0 }
   0xf   : > { %p926_p8 = por %p65_p5, %p64_p3  ;;  %p126_p10 = scmp.eq.s32.totalorder %s561_s16, 1 }
  0x10   : > { %p930_p9 = por %p120_p6, %p58_p1  ;;  %p613_p13 = scmp.lt.s32.totalorder %s854_s14, 2 }
  0x11   : > { %s1171_s21 = scalar_select %p926_p8, 1, 0 }
  0x12   : > { %s1172_s22 = scalar_select %p930_p9, 1, 0 }
  0x13   : > { %s935_s23 = scalar_select %p49_p7, %s842_s11, %s51_s18  }
  0x14   : > { %p937_p11 = por %p126_p10, %p64_p3  ;;  %s944_s25 = sand.u32 1, %s842_s11  }
  0x15   : > { %s564_s26 = sshll.u32 %s944_s25, 7  ;;  %s593_s27 = sshll.u32 %s850_s13, 11 }
  0x16   : > { %s1173_s24 = scalar_select %p937_p11, 1, 0 }
  0x17   : > { %s951_s30 = scalar_lea.hbm %s1165_s0, %s593_s27  ;;  %s150_s3 = scalar_lea.vmem [#allocation2], %s564_s26 }
  0x18   : > { %s160_s4 = sshll.u32 %s150_s3, 4  ;;  %p957_p0 = pnand %p613_p13, %p920_p4  ;;  %s953_s4 = int_to_ptr.vmem [resolvable:$true] %s160_s4 }
  0x19   : > { %s147_s6 = scalar_lea.sflag [#allocation3], %s944_s25  ;;  %s708_s7 = scalar_lea.hbm %s951_s30, 2048 }
  0x1a   : > { %p709_p2 = scmp.ne.s32.totalorder %s951_s30, %s708_s7  ;;  %p710_p3 = pneg %p957_p0 }
  0x1b   : > { %s713_s16 = scalar_lea.hbm %s1165_s0, 4096  ;;  %p714_p4 = scmp.lt.u32.totalorder %s951_s30, %s1165_s0 }
  0x1c   : > { %p711_p5 = pnand %p710_p3, %p709_p2  ;;  %p715_p7 = scmp.lt.u32.totalorder %s713_s16, %s708_s7 }
  0x1d   : > { %p717_p13 = scmp.lt.u32.totalorder %s708_s7, %s951_s30 }
  0x1e   : > { %p712_p6 = pneg %p711_p5  ;;  %p716_p10 = por %p715_p7, %p714_p4 }
  0x20   : > { %p718_p12 = por %p717_p13, %p716_p10 }
  0x22   : > { %p719_p1 = pnand %p718_p12, %p712_p6 }
  0x24   : > { %722 = shalt.err (!%p719_p1)
}
  0x25   : > { %s723_s20 = scalar_lea.vmem %s953_s4, 2048  ;;  %s856_s26 = smov [#allocation2]  }
  0x26   : > { %p724_p2 = scmp.ne.s32.totalorder %s953_s4, %s723_s20  ;;  %s728_s27 = sshll.u32 %s856_s26, 4  ;;  %s729_s27 = int_to_ptr.vmem [resolvable:$false] %s728_s27 }
  0x27   : > { %s730_s28 = scalar_lea.vmem %s729_s27, 4096  ;;  %p731_p9 = scmp.lt.s32.totalorder %s953_s4, %s729_s27 }
  0x28   : > { %p726_p5 = pnand %p724_p2, %p710_p3  ;;  %p732_p4 = scmp.lt.s32.totalorder %s730_s28, %s723_s20 }
  0x2a   : > { %p727_p11 = pneg %p726_p5  ;;  %p733_p7 = por %p732_p4, %p731_p9 }
  0x2c   : > { %p734_p10 = pnand %p733_p7, %p727_p11 }
  0x2e   : > { %737 = shalt.err (!%p734_p10)
}
  0x2f   : > { %s857_s29 = smov 128   ;;  %s858_s3 = smov 8  }
  0x30   : > { %605 = dma.hbm_to_vmem [thread:$0]  (!%p957_p0), %s951_s30, 2048, %s953_s4, %s147_s6, %s857_s29, %s857_s29, %s858_s3  }
  0x31   : > { %p188_p12 = scmp.lt.s32.totalorder %s854_s14, 3  ;;  %s567_s7 = sshll.u32 %s944_s25, 3 }
  0x32   : > { %s568_s8 = sshll.u32 %s850_s13, 7  ;;  %p1175_p9 = scmp.ge.s32.totalorder %s854_s14, 1 }
  0x33   : > { %s1002_s19 = scalar_lea.hbm %s1166_s1, %s568_s8  ;;  %s174_s20 = scalar_lea.vmem [#allocation5], %s567_s7 }
  0x34   : > { %p995_p11 = pnand %p1175_p9, %p188_p12  ;;  %s183_s26 = sshll.u32 %s174_s20, 4  ;;  %s184_s26 = int_to_ptr.vmem [resolvable:$true] %s183_s26 }
  0x35   : > { %s171_s30 = scalar_lea.sflag [#allocation6], %s944_s25  ;;  %s738_s4 = scalar_lea.hbm %s1002_s19, 128 }
  0x36   : > { %s1176_s15 = scalar_select %p995_p11, 1, 0 }
  0x37   : > { %p739_p1 = scmp.ne.s32.totalorder %s1002_s19, %s738_s4  ;;  %s743_s28 = scalar_lea.hbm %s1166_s1, 256 }
  0x38   : > { %p744_p2 = scmp.lt.u32.totalorder %s1002_s19, %s1166_s1  ;;  %p745_p5 = scmp.lt.u32.totalorder %s743_s28, %s738_s4 }
  0x39   : > { %p741_p6 = pnand %p739_p1, %p710_p3  ;;  %p747_p7 = scmp.lt.u32.totalorder %s738_s4, %s1002_s19 }
  0x3a   : > { %p746_p4 = por %p745_p5, %p744_p2 }
  0x3b   : > { %p742_p13 = pneg %p741_p6 }
  0x3c   : > { %p748_p10 = por %p747_p7, %p746_p4 }
  0x3e   : > { %p749_p12 = pnand %p748_p10, %p742_p13 }
  0x40   : > { %752 = shalt.err (!%p749_p12)
}
  0x41   : > { %s753_s25 = scalar_lea.vmem %s184_s26, 128  ;;  %s859_s7 = smov [#allocation5]  }
  0x42   : > { %p754_p9 = scmp.ne.s32.totalorder %s184_s26, %s753_s25  ;;  %s758_s8 = sshll.u32 %s859_s7, 4  ;;  %s759_s8 = int_to_ptr.vmem [resolvable:$false] %s758_s8 }
  0x43   : > { %s760_s16 = scalar_lea.vmem %s759_s8, 256  ;;  %p761_p8 = scmp.lt.s32.totalorder %s184_s26, %s759_s8 }
  0x44   : > { %p756_p1 = pnand %p754_p9, %p710_p3  ;;  %p762_p11 = scmp.lt.s32.totalorder %s760_s16, %s753_s25 }
  0x46   : > { %p757_p6 = pneg %p756_p1  ;;  %p763_p2 = por %p762_p11, %p761_p8 }
  0x48   : > { %p764_p5 = pnand %p763_p2, %p757_p6 }
  0x4a   : > { %767 = shalt.err (!%p764_p5)
}
  0x4b   : > { %608 = dma.hbm_to_vmem [thread:$0]  (!%p957_p0), %s1002_s19, 128, %s184_s26, %s171_s30  }
  0x4c   : > { %p1177_p13 = scmp.ne.s32.totalorder %s1176_s15, 0 }
  0x4d   : > { %s1027_s18 = sand.u32 (!%p1177_p13), 1, %s838_s10   ;;  %p1178_p3 = scmp.ne.s32.totalorder (!%p1177_p13), %s1171_s21, 0 }
  0x4e   : > { %192 = sbr.rel (%p1177_p13) target bundleno = 163 (0xa3), region = 28  ;;  %s570_s20 = sshll.u32 (!%p1177_p13), %s1027_s18, 7 }
  0x4f   : > { %s195_s4 = scalar_lea.sflag (!%p1177_p13), [#allocation3], %s1027_s18  ;;  %s198_s6 = scalar_lea.vmem (!%p1177_p13), [#allocation2], %s570_s20 }
  0x55   : > { %821 = dma.done.wait (%p1178_p3), %s195_s4, 2048  }
  0x56   : > { %823 = vsyncadd (%p1178_p3), %s195_s4, 4294965248  ;;  %s571_s5 = sshll.u32 %s1027_s18, 3  ;;  %s204_s15 = scalar_lea.sflag [#allocation6], %s1027_s18 }
  0x57   : > { %s1037_s19 = scalar_lea.vmem [#allocation5], %s571_s5 }
  0x58   : > { %825 = dma.done.wait (%p1178_p3), %s204_s15, 128  }
  0x59   : > { %827 = vsyncadd (%p1178_p3), %s204_s15, 4294967168  ;;  %v246_v0 = vld [vmem:[%s198_s6] sm:$0xff]  ;;  %v247_v1 = vld [vmem:[%s198_s6 + $0x8] sm:$0xff]  ;;  %s594_s21 = smul.u32 48, %s1027_s18  ;;  %p1183_p0 = scmp.ne.s32.totalorder %s1172_s22, 0 }
  0x5a   : > { %v248_v2 = vld [vmem:[%s198_s6 + $0x10] sm:$0xff]  ;;  %v249_v3 = vld [vmem:[%s198_s6 + $0x18] sm:$0xff]  ;;  %v250_v4 = vld [vmem:[%s198_s6 + $0x20] sm:$0xff]  ;;  %s595_s30 = smul.u32 768, %s846_s12  ;;  %s429_s12 = scalar_lea.sflag [#allocation4], %s1027_s18 }
  0x5b   : > { %v251_v5 = vld [vmem:[%s198_s6 + $0x28] sm:$0xff]  ;;  %v252_v6 = vld [vmem:[%s198_s6 + $0x30] sm:$0xff]  ;;  %v253_v7 = vld [vmem:[%s198_s6 + $0x38] sm:$0xff]  ;;  %v262_v9 = vmax.f32 %v246_v0, %v250_v4  ;;  %s1095_s26 = scalar_lea.vmem [#allocation7], %s594_s21  ;;  %s861_s7 = smov [#allocation7]  }
  0x5c   : > { %v254_v8 = vld [vmem:[%s198_s6 + $0x40] sm:$0xff]  ;;  %v265_v10 = vmax.f32 %v247_v1, %v251_v5  ;;  %v255_v11 = vld [vmem:[%s198_s6 + $0x48] sm:$0xff]  ;;  %v256_v12 = vld [vmem:[%s198_s6 + $0x50] sm:$0xff]  ;;  %v268_v14 = vmax.f32 %v248_v2, %v252_v6  ;;  %v271_v15 = vmax.f32 %v249_v3, %v253_v7  ;;  %s444_s27 = sshll.u32 %s1095_s26, 4  ;;  %s1110_s3 = scalar_lea.hbm %s1167_s2, %s595_s30  ;;  %s1112_s27 = int_to_ptr.vmem [resolvable:$true] %s444_s27 }
  0x5d   : > { %v257_v13 = vld [vmem:[%s198_s6 + $0x58] sm:$0xff]  ;;  %v258_v16 = vld [vmem:[%s198_s6 + $0x60] sm:$0xff]  ;;  %v259_v17 = vld [vmem:[%s198_s6 + $0x68] sm:$0xff]  ;;  %v263_v19 = vmax.f32 %v262_v9, %v254_v8  ;;  %s768_s25 = scalar_lea.vmem %s1112_s27, 768  ;;  %s772_s8 = sshll.u32 %s861_s7, 4  ;;  %s773_s8 = int_to_ptr.vmem [resolvable:$false] %s772_s8 }
  0x5e   : > { %v1043_v18 = vld [vmem:[%s198_s6 + $0x70] sm:$0xff]  ;;  %v266_v20 = vmax.f32 %v265_v10, %v255_v11  ;;  %v1045_v21 = vld [vmem:[%s198_s6 + $0x78] sm:$0xff]  ;;  %v269_v22 = vmax.f32 %v268_v14, %v256_v12  ;;  %v272_v23 = vmax.f32 %v271_v15, %v257_v13  ;;  %v350_v28 = vld [vmem:[%s1037_s19] sm:$0xff]  ;;  %p769_p8 = scmp.ne.s32.totalorder %s1112_s27, %s768_s25  ;;  %s774_s16 = scalar_lea.vmem %s773_s8, 1536 }
  0x5f   : > { %v264_v24 = vmax.f32 %v263_v19, %v258_v16  ;;  %v351_v34 = vunpack.c.0.s8 %v350_v28  ;;  %v352_v35 = vunpack.c.1.s8 %v350_v28  ;;  %v353_v38 = vunpack.c.2.s8 %v350_v28  ;;  %p775_p7 = scmp.lt.s32.totalorder %s1112_s27, %s773_s8  ;;  %p776_p10 = scmp.lt.s32.totalorder %s774_s16, %s768_s25 }
  0x60   : > { %v267_v25 = vmax.f32 %v266_v20, %v259_v17  ;;  %v1048_v26 = vmax.f32 %v269_v22, %v1043_v18  ;;  %v1051_v27 = vmax.f32 %v272_v23, %v1045_v21  ;;  %v354_v39 = vunpack.c.3.s8 %v350_v28  ;;  %p770_p11 = pnand %p769_p8, %p1183_p0 }
  0x61   : > { %v274_v29 = vsub.f32 %v246_v0, %v264_v24  ;;  %v278_v33 = vsub.f32 %v250_v4, %v264_v24  ;;  %v282_v44 = vsub.f32 %v254_v8, %v264_v24  ;;  %v286_v49 = vsub.f32 %v258_v16, %v264_v24  ;;  %p777_p12 = por %p776_p10, %p775_p7 }
  0x62   : > { %v275_v30 = vsub.f32 %v247_v1, %v267_v25  ;;  %v276_v31 = vsub.f32 %v248_v2, %v1048_v26  ;;  %v277_v32 = vsub.f32 %v249_v3, %v1051_v27  ;;  %v279_v36 = vsub.f32 %v251_v5, %v267_v25  ;;  %p771_p4 = pneg %p770_p11 }
  0x63   : > { %v280_v37 = vsub.f32 %v252_v6, %v1048_v26  ;;  %v281_v40 = vsub.f32 %v253_v7, %v1051_v27  ;;  %v290_v41 = vmul.f32 1.442695, %v274_v29  ;;  %v283_v45 = vsub.f32 %v255_v11, %v267_v25 }
  0x64   : > { %v292_v42 = vmul.f32 1.442695, %v275_v30  ;;  %v294_v43 = vmul.f32 1.442695, %v276_v31  ;;  %v284_v46 = vsub.f32 %v256_v12, %v1048_v26  ;;  %v296_v47 = vmul.f32 1.442695, %v277_v32  ;;  %p778_p9 = pnand %p777_p12, %p771_p4 }
  0x65   : > { %v285_v48 = vsub.f32 %v257_v13, %v1051_v27  ;;  %668 = vpow2.f32 %v290_v41  ;;  %v298_v50 = vmul.f32 1.442695, %v278_v33  ;;  %v287_v51 = vsub.f32 %v259_v17, %v267_v25 }
  0x66   : > { %v288_v52 = vsub.f32 %v1043_v18, %v1048_v26  ;;  %670 = vpow2.f32 %v292_v42  ;;  %v300_v53 = vmul.f32 1.442695, %v279_v36  ;;  %v289_v54 = vsub.f32 %v1045_v21, %v1051_v27 }
  0x67   : > { %672 = vpow2.f32 %v294_v43  ;;  %v302_v55 = vmul.f32 1.442695, %v280_v37  ;;  %v304_v56 = vmul.f32 1.442695, %v281_v40  ;;  %v306_v57 = vmul.f32 1.442695, %v282_v44 }
  0x68   : > { %674 = vpow2.f32 %v296_v47  ;;  %v308_v58 = vmul.f32 1.442695, %v283_v45  ;;  %v310_v59 = vmul.f32 1.442695, %v284_v46  ;;  %v312_v60 = vmul.f32 1.442695, %v285_v48 }
  0x69   : > { %676 = vpow2.f32 %v298_v50  ;;  %vm355_vm0 = vcmp.eq.s32.totalorder %v351_v34, 0  ;;  %vm356_vm1 = vcmp.eq.s32.totalorder %v352_v35, 0  ;;  %v314_v61 = vmul.f32 1.442695, %v286_v49 }
  0x6a   : > { %678 = vpow2.f32 %v300_v53  ;;  %v316_v62 = vmul.f32 1.442695, %v287_v51  ;;  %vm1064_vm2 = vcmp.eq.s32.totalorder %v353_v38, 0  ;;  %vm1068_vm3 = vcmp.eq.s32.totalorder %v354_v39, 0 }
  0x6b   : > { %680 = vpow2.f32 %v302_v55  ;;  %vm367_vm4 = vcmp.eq.s32.totalorder %v351_v34, 1  ;;  %vm368_vm5 = vcmp.eq.s32.totalorder %v352_v35, 1  ;;  %v860_v1 = vmov 0.0  }
  0x6c   : > { %682 = vpow2.f32 %v304_v56  ;;  %v1072_v2 = vsel %vm355_vm0, 1.0, %v860_v1  ;;  %v1074_v3 = vsel %vm356_vm1, 1.0, %v860_v1  ;;  %vm369_vm6 = vcmp.eq.s32.totalorder %v353_v38, 1 }
  0x6d   : > { %684 = vpow2.f32 %v306_v57  ;;  %v1076_v4 = vsel %vm367_vm4, 1.0, %v860_v1  ;;  %v1078_v5 = vsel %vm368_vm5, 1.0, %v860_v1  ;;  %v416_v6 = vadd.f32 %v1074_v3, %v1072_v2 }
  0x6e   : > { %686 = vpow2.f32 %v308_v58  ;;  %v1085_v7 = vsel %vm1064_vm2, 1.0, %v860_v1  ;;  %vm370_vm7 = vcmp.eq.s32.totalorder %v354_v39, 1  ;;  %v423_v8 = vadd.f32 %v1078_v5, %v1076_v4 }
  0x6f   : > { %v669_v9 = vpop.eup %668  ;;  %688 = vpow2.f32 %v310_v59  ;;  %v318_v10 = vmul.f32 1.442695, %v288_v52  ;;  %v1089_v11 = vsel %vm369_vm6, 1.0, %v860_v1  ;;  %v417_v12 = vadd.f32 %v1085_v7, %v416_v6 }
  0x70   : > { %v671_v13 = vpop.eup %670  ;;  %690 = vpow2.f32 %v312_v60  ;;  %v320_v14 = vmul.f32 1.442695, %v289_v54  ;;  %v575_v15 = vsel %vm1068_vm3, 1.0, %v860_v1  ;;  %v424_v16 = vadd.f32 %v1089_v11, %v423_v8 }
  0x71   : > { %v673_v17 = vpop.eup %672  ;;  %692 = vpow2.f32 %v314_v61  ;;  %v579_v18 = vsel %vm370_vm7, 1.0, %v860_v1  ;;  %v418_v19 = vadd.f32 %v575_v15, %v417_v12 }
  0x72   : > { %v675_v20 = vpop.eup %674  ;;  %694 = vpow2.f32 %v316_v62  ;;  %v425_v21 = vadd.f32 %v579_v18, %v424_v16 }
  0x73   : > { %v677_v22 = vpop.eup %676  ;;  %696 = vpow2.f32 %v318_v10  ;;  %587 = vst [vmem:[%s1095_s26 + $0x20] sm:$0xff] %v418_v19 }
  0x74   : > { %v679_v23 = vpop.eup %678  ;;  %698 = vpow2.f32 %v320_v14  ;;  %v322_v24 = vadd.f32 %v677_v22, %v669_v9  ;;  %589 = vst [vmem:[%s1095_s26 + $0x28] sm:$0xff] %v425_v21 }
  0x75   : > { %v681_v25 = vpop.eup %680  ;;  %v325_v26 = vadd.f32 %v679_v23, %v671_v13 }
  0x76   : > { %v683_v27 = vpop.eup %682  ;;  %v328_v28 = vadd.f32 %v681_v25, %v673_v17 }
  0x77   : > { %v685_v29 = vpop.eup %684  ;;  %v331_v30 = vadd.f32 %v683_v27, %v675_v20 }
  0x78   : > { %v687_v31 = vpop.eup %686  ;;  %v323_v32 = vadd.f32 %v685_v29, %v322_v24 }
  0x79   : > { %v689_v33 = vpop.eup %688  ;;  %v326_v34 = vadd.f32 %v687_v31, %v325_v26 }
  0x7a   : > { %v691_v35 = vpop.eup %690  ;;  %v329_v36 = vadd.f32 %v689_v33, %v328_v28 }
  0x7b   : > { %v693_v37 = vpop.eup %692  ;;  %v332_v38 = vadd.f32 %v691_v35, %v331_v30 }
  0x7c   : > { %v695_v39 = vpop.eup %694  ;;  %v324_v40 = vadd.f32 %v693_v37, %v323_v32 }
  0x7d   : > { %v697_v41 = vpop.eup %696  ;;  %v327_v42 = vadd.f32 %v695_v39, %v326_v34 }
  0x7e   : > { %v699_v43 = vpop.eup %698  ;;  %v330_v44 = vadd.f32 %v697_v41, %v329_v36  ;;  %700 = vrcp.f32 %v324_v40 }
  0x7f   : > { %v333_v45 = vadd.f32 %v699_v43, %v332_v38  ;;  %702 = vrcp.f32 %v327_v42 }
  0x80   : > { %704 = vrcp.f32 %v330_v44 }
  0x81   : > { %706 = vrcp.f32 %v333_v45 }
  0x88   : > { %v701_v46 = vpop.eup %700 }
  0x89   : > { %v703_v47 = vpop.eup %702  ;;  %v342_v48 = vmul.f32 %v701_v46, %v669_v9  ;;  %v346_v49 = vmul.f32 %v701_v46, %v677_v22 }
  0x8a   : > { %v705_v50 = vpop.eup %704  ;;  %v343_v51 = vmul.f32 %v703_v47, %v671_v13  ;;  %v347_v52 = vmul.f32 %v703_v47, %v679_v23 }
  0x8b   : > { %v707_v53 = vpop.eup %706  ;;  %v344_v54 = vmul.f32 %v705_v50, %v673_v17  ;;  %v380_v55 = vmul.f32 %v1072_v2, %v342_v48  ;;  %v348_v56 = vmul.f32 %v705_v50, %v681_v25  ;;  %v391_v57 = vmul.f32 %v1076_v4, %v346_v49 }
  0x8c   : > { %v345_v58 = vmul.f32 %v707_v53, %v675_v20  ;;  %v381_v59 = vmul.f32 %v1074_v3, %v343_v51  ;;  %v349_v60 = vmul.f32 %v707_v53, %v683_v27  ;;  %v392_v61 = vmul.f32 %v1078_v5, %v347_v52 }
  0x8d   : > { %v382_v62 = vmul.f32 %v1085_v7, %v344_v54  ;;  %v393_v63 = vmul.f32 %v1089_v11, %v348_v56  ;;  %v402_v0 = vadd.f32 %v343_v51, %v342_v48  ;;  %v409_v1 = vadd.f32 %v347_v52, %v346_v49 }
  0x8e   : > { %v383_v6 = vmul.f32 %v575_v15, %v345_v58  ;;  %v384_v2 = vadd.f32 %v381_v59, %v380_v55  ;;  %v394_v8 = vmul.f32 %v579_v18, %v349_v60  ;;  %v395_v4 = vadd.f32 %v392_v61, %v391_v57 }
  0x8f   : > { %v403_v9 = vadd.f32 %v402_v0, %v344_v54  ;;  %v410_v3 = vadd.f32 %v409_v1, %v348_v56 }
  0x90   : > { %v385_v10 = vadd.f32 %v384_v2, %v382_v62  ;;  %v396_v5 = vadd.f32 %v395_v4, %v393_v63 }
  0x91   : > { %v404_v7 = vadd.f32 %v403_v9, %v345_v58  ;;  %v411_v12 = vadd.f32 %v410_v3, %v349_v60 }
  0x92   : > { %v386_v11 = vadd.f32 %v385_v10, %v383_v6  ;;  %v397_v13 = vadd.f32 %v396_v5, %v394_v8 }
  0x93   : > { %583 = vst [vmem:[%s1095_s26 + $0x10] sm:$0xff] %v404_v7  ;;  %585 = vst [vmem:[%s1095_s26 + $0x18] sm:$0xff] %v411_v12 }
  0x94   : > { %388 = vst [vmem:[%s1095_s26] sm:$0xff] %v386_v11  ;;  %581 = vst [vmem:[%s1095_s26 + $0x8] sm:$0xff] %v397_v13 }
  0x95   : > { %781 = shalt.err (!%p778_p9)
}
  0x96   : > { %s782_s20 = scalar_lea.hbm %s1110_s3, 768  ;;  %s786_s5 = scalar_lea.hbm %s1167_s2, 1536 }
  0x97   : > { %p783_p1 = scmp.ne.s32.totalorder %s1110_s3, %s782_s20  ;;  %p787_p5 = scmp.lt.u32.totalorder %s1110_s3, %s1167_s2 }
  0x98   : > { %p788_p13 = scmp.lt.u32.totalorder %s786_s5, %s782_s20  ;;  %p790_p8 = scmp.lt.u32.totalorder %s782_s20, %s1110_s3 }
  0x99   : > { %p784_p6 = pnand %p783_p1, %p1183_p0 }
  0x9a   : > { %p789_p3 = por %p788_p13, %p787_p5 }
  0x9b   : > { %p785_p2 = pneg %p784_p6 }
  0x9c   : > { %p791_p11 = por %p790_p8, %p789_p3 }
  0x9e   : > { %p792_p4 = pnand %p791_p11, %p785_p2 }
  0xa0   : > { %795 = shalt.err (!%p792_p4)
}
  0xa1   : > { %s862_s21 = smov 128   ;;  %s863_s26 = smov 8  }
  0xa2   : > { %600 = dma.vmem_to_hbm [thread:$0]  (%p1183_p0), %s1112_s27, 768, %s1110_s3, %s429_s12, %s862_s21, %s862_s21, %s863_s26  }
  0xa3 PF: > { %s459_s30 = sand.u32 1, %s834_s9   ;;  %p1184_p7 = scmp.ne.s32.totalorder %s1173_s24, 0 }
  0xa4   : > { %p1185_p10 = scmp.ge.s32.totalorder %s854_s14, 2  ;;  %s460_s28 = scalar_lea.sflag [#allocation4], %s459_s30 }
  0xa6   : > { %p610_p12 = pnand %p1185_p10, %p1184_p7 }
  0xa8   : > { %829 = dma.done.wait (!%p610_p12), %s460_s28, 768  }
  0xa9   : > { %831 = vsyncadd (!%p610_p12), %s460_s28, 4294966528  ;;  %s21_s14 = sadd.s32 1, %s854_s14   ;;  %s1186_s9 = smov %s838_s10 }
  0xaa   : > { %p18_p9 = scmp.ge.s32.totalorder %s21_s14, 4   ;;  %s1187_s10 = smov %s842_s11 }
  0xab   : > { %s1188_s11 = smov %s935_s23  ;;  %s1189_s12 = smov %s850_s13 }
  0xac   : > { %s1190_s13 = smov %s1192_s17  ;;  %20 = sbr.rel (!%p18_p9) target bundleno = 8 (0x8), region = 95 }
  0xb3   :  { %465 = vsyncpa [#allocation3], 1 }
  0xb4   :  { %467 = vsyncpa [#allocation3 + $0x1], 1 }
  0xb5   :  { %468 = vsyncpa [#allocation6], 1 }
  0xb6   :  { %470 = vsyncpa [#allocation6 + $0x1], 1 }
  0xb7   :  { %471 = vsyncpa [#allocation4], 1 }
  0xb8   :  { %473 = vsyncpa [#allocation4 + $0x1], 1 }

</bundles_post_ra>
